<compile_context>
chip_gen: v5e
topology: v5e:2x2
jax: 0.10.0
libtpu: 0.0.40
codegen_flags: <defaults>
</compile_context>

<pallas_src>
import functools
import math
import numpy as np
import jax
import jax.numpy as jnp
from jax.experimental import pallas as pl
from jax.experimental.pallas import tpu as pltpu

LANE = 128
SUB = 8


def _cdiv(a, b):
    return -(-a // b)


# ----------------------- host-side precompute (mirrors torch __init__) ------
def compile_A(max_n, theta_list):
    theta_arr = np.array(theta_list)
    A_list = []
    for m in range(max_n, 0, -1):
        A_list.append(np.sin(m * theta_arr).tolist())
    for m in range(0, max_n + 1):
        A_list.append(np.cos(m * theta_arr).tolist())
    return A_list


def generate_radial_polynomial(max_n, polynomial_coefficient, n, m):
    res = [0.0] * (max_n + 1)
    if (n - m) % 2 == 1:
        return res
    mid_nm = int((n + abs(m)) / 2)
    delta_nm = int((n - abs(m)) / 2)
    for k in range(0, delta_nm + 1):
        k_factorial = math.factorial(k)
        mid_factorial = math.factorial(mid_nm - k)
        delta_factorial = math.factorial(delta_nm - k)
        delta_nk_factorial = math.factorial(n - k)
        fac_rho = pow(-1, k) * delta_nk_factorial
        fac_div = k_factorial * mid_factorial * delta_factorial
        fac_rho = fac_rho / fac_div
        rho_index = n - 2 * k
        res[rho_index] = polynomial_coefficient * fac_rho
    return res


def get_radial_polynomial_coefficients(n, m):
    if (n - m) % 2 == 1:
        return 0
    if m == 0:
        return n + 1
    else:
        return 2 * (n + 1)


def compile_bjm(s, wgt_list, max_n):
    gen_cnt = 0
    bjm_list = []

    def add_lists(list1, list2):
        return [x + y for x, y in zip(list1, list2)]

    for m in range(-max_n, max_n + 1):
        partial_sum = [0.0] * (max_n + 1)
        for n in range(abs(m), max_n + 1, 2):
            polynomial_coefficient = get_radial_polynomial_coefficients(n=n, m=m)
            radial_ploynomial = generate_radial_polynomial(
                max_n=max_n,
                polynomial_coefficient=wgt_list[gen_cnt] * np.sqrt(polynomial_coefficient),
                n=n, m=m)
            partial_sum = add_lists(partial_sum, radial_ploynomial)
            gen_cnt = gen_cnt + 1
            if gen_cnt > s - 1:
                break
        bjm_list.append(partial_sum)
        if gen_cnt > s - 1:
            gen_cnt = 0
            break
    return bjm_list


# ----------------------------- Pallas kernel ---------------------------------
def zernike_kernel(bjm_ref, rho_ref, a_ref, fig_ref, *, R, N):
    """bjm_ref: SMEM (R*N,) f32, scalar-prefetched (row-major, idx = r*N + k)
       rho_ref: VMEM (TS, 128) f32
       a_ref  : VMEM (R, TS, 128) (f32 or bf16; upcast once per row below)
       fig_ref: VMEM (TS, 128) f32
    """
    rho = rho_ref[...]                                        # (TS, 128) - full vregs

    # Load each angular row of A once as a dense (TS, 128) slab.
    a_rows = [a_ref[r].astype(jnp.float32) for r in range(R)]

    # D_k[f] = sum_r bjm[r, k] * A[r, f]  -- SMEM scalar * vector FMAs (VPU only)
    def d_row(k):
        d = bjm_ref[k] * a_rows[0]                            # r = 0
        for r in range(1, R):
            d = d + bjm_ref[r * N + k] * a_rows[r]
        return d

    # fig[f] = sum_k rho[f]^k * D_k[f]  via Horner: no rcu, no MXU, no XLU reduce.
    acc = d_row(N - 1)
    for k in range(N - 2, -1, -1):
        acc = acc * rho + d_row(k)

    fig_ref[...] = acc.astype(fig_ref.dtype)


def _choose_tiling(F):
    """Pick (block_rows, n_blocks) over the (rows, 128) relayout of the F axis."""
    n_rows = _cdiv(F, LANE)
    n_rows = _cdiv(n_rows, SUB) * SUB          # sublane-align the row count

    SINGLE_BLOCK_MAX_ROWS = 512                # <= ~64K points: one grid step
    TARGET_ROWS = 512                          # ~2.3 MiB moved per step (f32, R=7)

    if n_rows <= SINGLE_BLOCK_MAX_ROWS:
        return n_rows, 1

    n_blocks = _cdiv(n_rows, TARGET_ROWS)
    if n_blocks % 2:                           # even block count -> both v7x TCs busy
        n_blocks += 1
    block_rows = _cdiv(_cdiv(n_rows, n_blocks), SUB) * SUB
    n_blocks = _cdiv(n_rows, block_rows)
    return block_rows, n_blocks


def zernike_forward(rho, bjm, A, *, block_rows=None, a_dtype=jnp.float32):
    """rho: (F,), bjm: (R, N), A: (R, F)  -> fig: (F,)

    a_dtype=jnp.bfloat16 roughly halves HBM traffic for large F (the kernel
    upcasts before any arithmetic, so it is v5e-safe) at reduced precision.
    """
    F = rho.shape[0]
    R, N = bjm.shape

    if block_rows is None:
        block_rows, n_blocks = _choose_tiling(F)
    else:
        block_rows = max(SUB, (block_rows // SUB) * SUB)
        n_blocks = _cdiv(_cdiv(F, LANE), block_rows)

    n_rows_pad = block_rows * n_blocks
    F_pad = n_rows_pad * LANE
    pad_f = F_pad - F

    rho_f32 = rho.astype(jnp.float32)
    A_c = A.astype(a_dtype)
    if pad_f:                                   # skip the pad when layouts line up
        rho_f32 = jnp.pad(rho_f32, (0, pad_f))
        A_c = jnp.pad(A_c, ((0, 0), (0, pad_f)))
    rho2 = rho_f32.reshape(n_rows_pad, LANE)    # (rows, 128): full (8,128) vregs
    A_p = A_c.reshape(R, n_rows_pad, LANE)
    bjm_flat = bjm.astype(jnp.float32).reshape(-1)   # (R*N,) row-major scalars

    kernel = functools.partial(zernike_kernel, R=R, N=N)

    # Double-buffered per-step footprint: 2*(R+2)*block_rows*128*4 B
    # (~4.7 MiB at block_rows=512, R=7) -- well under the 32 MiB scoped VMEM
    # default on every generation, so no explicit vmem_limit_bytes needed.
    out = pl.pallas_call(
        kernel,
        out_shape=jax.ShapeDtypeStruct((n_rows_pad, LANE), jnp.float32),
        grid_spec=pltpu.PrefetchScalarGridSpec(
            num_scalar_prefetch=1,              # bjm -> SMEM once, before the grid
            grid=(n_blocks,),
            in_specs=[
                pl.BlockSpec((block_rows, LANE), lambda i, bjm_s: (i, 0)),     # rho
                pl.BlockSpec((R, block_rows, LANE), lambda i, bjm_s: (0, i, 0)),  # A
            ],
            out_specs=pl.BlockSpec((block_rows, LANE), lambda i, bjm_s: (i, 0)),
        ),
        compiler_params=pltpu.CompilerParams(
            dimension_semantics=("parallel",)),
    )(bjm_flat, rho2, A_p)
    return out.reshape(-1)[:F]


# ---------------------------------- main --------------------------------------
if __name__ == "__main__":
    max_n = 4                      # radial order count (powers rho^0 .. rho^{max_n-1})
    full_size = 256                # number of (rho, theta) sample points

    # list_mn: all (m, n) Zernike modes up to order max_n-1 (defines max_s)
    list_mn = []
    for m in range(-(max_n - 1), max_n):
        for n in range(abs(m), max_n, 2):
            list_mn.append((m, n))
    max_s = len(list_mn)           # 10 for max_n=4 -> no early break in compile_bjm

    key = jax.random.PRNGKey(0)
    k_rho, k_theta, k_wgt = jax.random.split(key, 3)
    rho_np = np.asarray(jax.random.uniform(k_rho, (full_size,), jnp.float32,
                                           minval=0.05, maxval=0.95))
    theta_np = np.asarray(jax.random.uniform(k_theta, (full_size,), jnp.float32,
                                             minval=0.0, maxval=2.0 * math.pi))
    wgt_np = np.asarray(jax.random.uniform(k_wgt, (max_s,), jnp.float32,
                                           minval=-1.0, maxval=1.0))

    bjm_np = np.array(compile_bjm(s=max_s, wgt_list=wgt_np.tolist(), max_n=max_n - 1),
                      dtype=np.float32)                        # (2*max_n-1, max_n)
    A_np = np.array(compile_A(max_n=max_n - 1, theta_list=theta_np.tolist()),
                    dtype=np.float32)                          # (2*max_n-1, full_size)

    rho = jnp.asarray(rho_np)
    bjm = jnp.asarray(bjm_np)
    A = jnp.asarray(A_np)

    fig = zernike_forward(rho, bjm, A)
    fig = jax.block_until_ready(fig)

    # pure-JAX reference (mirrors the PyTorch forward exactly)
    cp = jnp.cumprod(jnp.broadcast_to(rho[:, None], (full_size, max_n)), axis=1)
    rcu_ref = jnp.concatenate([jnp.ones((full_size, 1), jnp.float32),
                               cp[:, :max_n - 1]], axis=1)
    fig_ref = ((rcu_ref @ bjm.T) * A.T).sum(axis=1)

    assert fig.shape == (full_size,)
    np.testing.assert_allclose(np.asarray(fig), np.asarray(fig_ref),
                               rtol=1e-5, atol=1e-5)
    print("KERNEL_OK")
</pallas_src>

<mosaic_0001>
module attributes {stable_mosaic.version = 11 : i64} {
  func.func @zernike_kernel(%arg0: i32, %arg1: memref<28xf32, #tpu.memory_space<smem>>, %arg2: memref<8x128xf32, #tpu.memory_space<vmem>>, %arg3: memref<7x8x128xf32, #tpu.memory_space<vmem>>, %arg4: memref<8x128xf32, #tpu.memory_space<vmem>>) attributes {dimension_semantics = [#tpu.dimension_semantics<parallel>], iteration_bounds = array<i64: 1>, scalar_prefetch = 1 : i64, scratch_operands = 0 : i64, tpu.core_type = #tpu.core_type<tc>, window_params = [{transform_indices = @transform_0, window_bounds = array<i64: 8, 128>}, {transform_indices = @transform_1, window_bounds = array<i64: 7, 8, 128>}, {transform_indices = @transform_2, window_bounds = array<i64: 8, 128>}]} {
    %c0 = arith.constant 0 : index
    %c0_0 = arith.constant 0 : index
    %0 = vector.load %arg2[%c0, %c0_0] : memref<8x128xf32, #tpu.memory_space<vmem>>, vector<8x128xf32>
    %c0_1 = arith.constant 0 : index
    %c0_2 = arith.constant 0 : index
    %c0_3 = arith.constant 0 : index
    %1 = vector.load %arg3[%c0_1, %c0_2, %c0_3] : memref<7x8x128xf32, #tpu.memory_space<vmem>>, vector<1x8x128xf32>
    %2 = vector.shape_cast %1 : vector<1x8x128xf32> to vector<8x128xf32>
    %c1 = arith.constant 1 : index
    %c0_4 = arith.constant 0 : index
    %c0_5 = arith.constant 0 : index
    %3 = vector.load %arg3[%c1, %c0_4, %c0_5] : memref<7x8x128xf32, #tpu.memory_space<vmem>>, vector<1x8x128xf32>
    %4 = vector.shape_cast %3 : vector<1x8x128xf32> to vector<8x128xf32>
    %c2 = arith.constant 2 : index
    %c0_6 = arith.constant 0 : index
    %c0_7 = arith.constant 0 : index
    %5 = vector.load %arg3[%c2, %c0_6, %c0_7] : memref<7x8x128xf32, #tpu.memory_space<vmem>>, vector<1x8x128xf32>
    %6 = vector.shape_cast %5 : vector<1x8x128xf32> to vector<8x128xf32>
    %c3 = arith.constant 3 : index
    %c0_8 = arith.constant 0 : index
    %c0_9 = arith.constant 0 : index
    %7 = vector.load %arg3[%c3, %c0_8, %c0_9] : memref<7x8x128xf32, #tpu.memory_space<vmem>>, vector<1x8x128xf32>
    %8 = vector.shape_cast %7 : vector<1x8x128xf32> to vector<8x128xf32>
    %c4 = arith.constant 4 : index
    %c0_10 = arith.constant 0 : index
    %c0_11 = arith.constant 0 : index
    %9 = vector.load %arg3[%c4, %c0_10, %c0_11] : memref<7x8x128xf32, #tpu.memory_space<vmem>>, vector<1x8x128xf32>
    %10 = vector.shape_cast %9 : vector<1x8x128xf32> to vector<8x128xf32>
    %c5 = arith.constant 5 : index
    %c0_12 = arith.constant 0 : index
    %c0_13 = arith.constant 0 : index
    %11 = vector.load %arg3[%c5, %c0_12, %c0_13] : memref<7x8x128xf32, #tpu.memory_space<vmem>>, vector<1x8x128xf32>
    %12 = vector.shape_cast %11 : vector<1x8x128xf32> to vector<8x128xf32>
    %c6 = arith.constant 6 : index
    %c0_14 = arith.constant 0 : index
    %c0_15 = arith.constant 0 : index
    %13 = vector.load %arg3[%c6, %c0_14, %c0_15] : memref<7x8x128xf32, #tpu.memory_space<vmem>>, vector<1x8x128xf32>
    %14 = vector.shape_cast %13 : vector<1x8x128xf32> to vector<8x128xf32>
    %c3_16 = arith.constant 3 : index
    %15 = memref.load %arg1[%c3_16] : memref<28xf32, #tpu.memory_space<smem>>
    %16 = vector.broadcast %15 : f32 to vector<8x128xf32>
    %17 = arith.mulf %16, %2 : vector<8x128xf32>
    %c7 = arith.constant 7 : index
    %18 = memref.load %arg1[%c7] : memref<28xf32, #tpu.memory_space<smem>>
    %19 = vector.broadcast %18 : f32 to vector<8x128xf32>
    %20 = arith.mulf %19, %4 : vector<8x128xf32>
    %21 = arith.addf %17, %20 : vector<8x128xf32>
    %c11 = arith.constant 11 : index
    %22 = memref.load %arg1[%c11] : memref<28xf32, #tpu.memory_space<smem>>
    %23 = vector.broadcast %22 : f32 to vector<8x128xf32>
    %24 = arith.mulf %23, %6 : vector<8x128xf32>
    %25 = arith.addf %21, %24 : vector<8x128xf32>
    %c15 = arith.constant 15 : index
    %26 = memref.load %arg1[%c15] : memref<28xf32, #tpu.memory_space<smem>>
    %27 = vector.broadcast %26 : f32 to vector<8x128xf32>
    %28 = arith.mulf %27, %8 : vector<8x128xf32>
    %29 = arith.addf %25, %28 : vector<8x128xf32>
    %c19 = arith.constant 19 : index
    %30 = memref.load %arg1[%c19] : memref<28xf32, #tpu.memory_space<smem>>
    %31 = vector.broadcast %30 : f32 to vector<8x128xf32>
    %32 = arith.mulf %31, %10 : vector<8x128xf32>
    %33 = arith.addf %29, %32 : vector<8x128xf32>
    %c23 = arith.constant 23 : index
    %34 = memref.load %arg1[%c23] : memref<28xf32, #tpu.memory_space<smem>>
    %35 = vector.broadcast %34 : f32 to vector<8x128xf32>
    %36 = arith.mulf %35, %12 : vector<8x128xf32>
    %37 = arith.addf %33, %36 : vector<8x128xf32>
    %c27 = arith.constant 27 : index
    %38 = memref.load %arg1[%c27] : memref<28xf32, #tpu.memory_space<smem>>
    %39 = vector.broadcast %38 : f32 to vector<8x128xf32>
    %40 = arith.mulf %39, %14 : vector<8x128xf32>
    %41 = arith.addf %37, %40 : vector<8x128xf32>
    %42 = arith.mulf %41, %0 : vector<8x128xf32>
    %c2_17 = arith.constant 2 : index
    %43 = memref.load %arg1[%c2_17] : memref<28xf32, #tpu.memory_space<smem>>
    %44 = vector.broadcast %43 : f32 to vector<8x128xf32>
    %45 = arith.mulf %44, %2 : vector<8x128xf32>
    %c6_18 = arith.constant 6 : index
    %46 = memref.load %arg1[%c6_18] : memref<28xf32, #tpu.memory_space<smem>>
    %47 = vector.broadcast %46 : f32 to vector<8x128xf32>
    %48 = arith.mulf %47, %4 : vector<8x128xf32>
    %49 = arith.addf %45, %48 : vector<8x128xf32>
    %c10 = arith.constant 10 : index
    %50 = memref.load %arg1[%c10] : memref<28xf32, #tpu.memory_space<smem>>
    %51 = vector.broadcast %50 : f32 to vector<8x128xf32>
    %52 = arith.mulf %51, %6 : vector<8x128xf32>
    %53 = arith.addf %49, %52 : vector<8x128xf32>
    %c14 = arith.constant 14 : index
    %54 = memref.load %arg1[%c14] : memref<28xf32, #tpu.memory_space<smem>>
    %55 = vector.broadcast %54 : f32 to vector<8x128xf32>
    %56 = arith.mulf %55, %8 : vector<8x128xf32>
    %57 = arith.addf %53, %56 : vector<8x128xf32>
    %c18 = arith.constant 18 : index
    %58 = memref.load %arg1[%c18] : memref<28xf32, #tpu.memory_space<smem>>
    %59 = vector.broadcast %58 : f32 to vector<8x128xf32>
    %60 = arith.mulf %59, %10 : vector<8x128xf32>
    %61 = arith.addf %57, %60 : vector<8x128xf32>
    %c22 = arith.constant 22 : index
    %62 = memref.load %arg1[%c22] : memref<28xf32, #tpu.memory_space<smem>>
    %63 = vector.broadcast %62 : f32 to vector<8x128xf32>
    %64 = arith.mulf %63, %12 : vector<8x128xf32>
    %65 = arith.addf %61, %64 : vector<8x128xf32>
    %c26 = arith.constant 26 : index
    %66 = memref.load %arg1[%c26] : memref<28xf32, #tpu.memory_space<smem>>
    %67 = vector.broadcast %66 : f32 to vector<8x128xf32>
    %68 = arith.mulf %67, %14 : vector<8x128xf32>
    %69 = arith.addf %65, %68 : vector<8x128xf32>
    %70 = arith.addf %42, %69 : vector<8x128xf32>
    %71 = arith.mulf %70, %0 : vector<8x128xf32>
    %c1_19 = arith.constant 1 : index
    %72 = memref.load %arg1[%c1_19] : memref<28xf32, #tpu.memory_space<smem>>
    %73 = vector.broadcast %72 : f32 to vector<8x128xf32>
    %74 = arith.mulf %73, %2 : vector<8x128xf32>
    %c5_20 = arith.constant 5 : index
    %75 = memref.load %arg1[%c5_20] : memref<28xf32, #tpu.memory_space<smem>>
    %76 = vector.broadcast %75 : f32 to vector<8x128xf32>
    %77 = arith.mulf %76, %4 : vector<8x128xf32>
    %78 = arith.addf %74, %77 : vector<8x128xf32>
    %c9 = arith.constant 9 : index
    %79 = memref.load %arg1[%c9] : memref<28xf32, #tpu.memory_space<smem>>
    %80 = vector.broadcast %79 : f32 to vector<8x128xf32>
    %81 = arith.mulf %80, %6 : vector<8x128xf32>
    %82 = arith.addf %78, %81 : vector<8x128xf32>
    %c13 = arith.constant 13 : index
    %83 = memref.load %arg1[%c13] : memref<28xf32, #tpu.memory_space<smem>>
    %84 = vector.broadcast %83 : f32 to vector<8x128xf32>
    %85 = arith.mulf %84, %8 : vector<8x128xf32>
    %86 = arith.addf %82, %85 : vector<8x128xf32>
    %c17 = arith.constant 17 : index
    %87 = memref.load %arg1[%c17] : memref<28xf32, #tpu.memory_space<smem>>
    %88 = vector.broadcast %87 : f32 to vector<8x128xf32>
    %89 = arith.mulf %88, %10 : vector<8x128xf32>
    %90 = arith.addf %86, %89 : vector<8x128xf32>
    %c21 = arith.constant 21 : index
    %91 = memref.load %arg1[%c21] : memref<28xf32, #tpu.memory_space<smem>>
    %92 = vector.broadcast %91 : f32 to vector<8x128xf32>
    %93 = arith.mulf %92, %12 : vector<8x128xf32>
    %94 = arith.addf %90, %93 : vector<8x128xf32>
    %c25 = arith.constant 25 : index
    %95 = memref.load %arg1[%c25] : memref<28xf32, #tpu.memory_space<smem>>
    %96 = vector.broadcast %95 : f32 to vector<8x128xf32>
    %97 = arith.mulf %96, %14 : vector<8x128xf32>
    %98 = arith.addf %94, %97 : vector<8x128xf32>
    %99 = arith.addf %71, %98 : vector<8x128xf32>
    %100 = arith.mulf %99, %0 : vector<8x128xf32>
    %c0_21 = arith.constant 0 : index
    %101 = memref.load %arg1[%c0_21] : memref<28xf32, #tpu.memory_space<smem>>
    %102 = vector.broadcast %101 : f32 to vector<8x128xf32>
    %103 = arith.mulf %102, %2 : vector<8x128xf32>
    %c4_22 = arith.constant 4 : index
    %104 = memref.load %arg1[%c4_22] : memref<28xf32, #tpu.memory_space<smem>>
    %105 = vector.broadcast %104 : f32 to vector<8x128xf32>
    %106 = arith.mulf %105, %4 : vector<8x128xf32>
    %107 = arith.addf %103, %106 : vector<8x128xf32>
    %c8 = arith.constant 8 : index
    %108 = memref.load %arg1[%c8] : memref<28xf32, #tpu.memory_space<smem>>
    %109 = vector.broadcast %108 : f32 to vector<8x128xf32>
    %110 = arith.mulf %109, %6 : vector<8x128xf32>
    %111 = arith.addf %107, %110 : vector<8x128xf32>
    %c12 = arith.constant 12 : index
    %112 = memref.load %arg1[%c12] : memref<28xf32, #tpu.memory_space<smem>>
    %113 = vector.broadcast %112 : f32 to vector<8x128xf32>
    %114 = arith.mulf %113, %8 : vector<8x128xf32>
    %115 = arith.addf %111, %114 : vector<8x128xf32>
    %c16 = arith.constant 16 : index
    %116 = memref.load %arg1[%c16] : memref<28xf32, #tpu.memory_space<smem>>
    %117 = vector.broadcast %116 : f32 to vector<8x128xf32>
    %118 = arith.mulf %117, %10 : vector<8x128xf32>
    %119 = arith.addf %115, %118 : vector<8x128xf32>
    %c20 = arith.constant 20 : index
    %120 = memref.load %arg1[%c20] : memref<28xf32, #tpu.memory_space<smem>>
    %121 = vector.broadcast %120 : f32 to vector<8x128xf32>
    %122 = arith.mulf %121, %12 : vector<8x128xf32>
    %123 = arith.addf %119, %122 : vector<8x128xf32>
    %c24 = arith.constant 24 : index
    %124 = memref.load %arg1[%c24] : memref<28xf32, #tpu.memory_space<smem>>
    %125 = vector.broadcast %124 : f32 to vector<8x128xf32>
    %126 = arith.mulf %125, %14 : vector<8x128xf32>
    %127 = arith.addf %123, %126 : vector<8x128xf32>
    %128 = arith.addf %100, %127 : vector<8x128xf32>
    %c0_23 = arith.constant 0 : index
    %c0_24 = arith.constant 0 : index
    %129 = vector.load %arg4[%c0_23, %c0_24] : memref<8x128xf32, #tpu.memory_space<vmem>>, vector<8x128xf32>
    tpu.vector_store %arg4[%c0_23, %c0_24], %128 {strides = array<i32>} : memref<8x128xf32, #tpu.memory_space<vmem>>, vector<8x128xf32>,
    return
  }
  func.func @transform_0(%arg0: i32, %arg1: memref<28xf32, #tpu.memory_space<smem>>) -> (i32, i32) {
    %c0_i32 = arith.constant 0 : i32
    %c0_i32_0 = arith.constant 0 : i32
    return %arg0, %c0_i32 : i32, i32
  }
  func.func @transform_1(%arg0: i32, %arg1: memref<28xf32, #tpu.memory_space<smem>>) -> (i32, i32, i32) {
    %c0_i32 = arith.constant 0 : i32
    %c0_i32_0 = arith.constant 0 : i32
    %c0_i32_1 = arith.constant 0 : i32
    return %c0_i32, %arg0, %c0_i32_0 : i32, i32, i32
  }
  func.func @transform_2(%arg0: i32, %arg1: memref<28xf32, #tpu.memory_space<smem>>) -> (i32, i32) {
    %c0_i32 = arith.constant 0 : i32
    %c0_i32_0 = arith.constant 0 : i32
    return %arg0, %c0_i32 : i32, i32
  }
}

</mosaic_0001>

<bundles_post_ra>
// kernel: tpu_custom_call.1
= control target key start
LH: loop header
LB: loop body
LE: loop exit
PB: predicated region body
PF: predicated region fallthrough
CT: control target
= control target key end

     0   :  { %s323_s15 = smov [#allocation3]   ;;  %s418_s0 = inlined_call_operand.hbm [shape: f32[28], index: 0, kind: input, shape index: {}]   ;;  %s419_s1 = inlined_call_operand.hbm [shape: f32[8,128], index: 1, kind: input, shape index: {}]   ;;  %s420_s2 = inlined_call_operand.hbm [shape: f32[7,8,128], index: 2, kind: input, shape index: {}]   ;;  %s421_s3 = inlined_call_operand.hbm [shape: f32[8,128], index: 3, kind: output, shape index: {}]  }
   0x1   :  { %s9_s14 = sshll.u32 %s418_s0, 4  ;;  %s10_s14 = int_to_ptr.hbm [resolvable:$true] %s9_s14 }
   0x2   :  { %12 = dma.hbm_to_smem %s10_s14, 16, %s323_s15, [#allocation2] }
   0x3   :  { %315 = dma.done.wait [#allocation2], 16 }
   0x4   :  { %316 = vsyncadd [#allocation2], 4294967280 }
   0x5   :  { %15 = sfence }
   0x6   :  { %16 = vsyncpa [#allocation5], 0 }
   0x7   :  { %17 = vsyncpa [#allocation8], 0 }
   0x8   :  { %18 = vsyncpa [#allocation6], 0  ;;  %s24_s18 = sshll.u32 %s419_s1, 4  ;;  %s324_s19 = smov [#allocation4]   ;;  %s25_s18 = int_to_ptr.hbm [resolvable:$true] %s24_s18 }
   0x9   :  { %s26_s20 = sshll.u32 %s324_s19, 4  ;;  %s34_s0 = sshll.u32 %s420_s2, 4  ;;  %s27_s20 = int_to_ptr.vmem [resolvable:$true] %s26_s20  ;;  %s35_s0 = int_to_ptr.hbm [resolvable:$true] %s34_s0 }
   0xa   :  { %29 = dma.hbm_to_vmem [thread:$0]  %s25_s18, 128, %s27_s20, [#allocation5]  }
   0xb   :  { %s325_s23 = smov [#allocation7]   ;;  %s326_s25 = smov 128  }
   0xc   :  { %s36_s24 = sshll.u32 %s325_s23, 4  ;;  %s327_s26 = smov 8   ;;  %s37_s24 = int_to_ptr.vmem [resolvable:$true] %s36_s24 }
   0xd   :  { %42 = dma.hbm_to_vmem [thread:$0]  %s35_s0, 896, %s37_s24, [#allocation8], %s326_s25, %s326_s25, %s327_s26  }
   0xe   :  { %317 = dma.done.wait [#allocation5], 128  }
   0xf   :  { %318 = vsyncadd [#allocation5], 4294967168 }
  0x10   :  { %319 = dma.done.wait [#allocation8], 896  }
  0x11   :  { %320 = vsyncadd [#allocation8], 4294966400  ;;  %s198_s1 = sld [smem:[#allocation3 + $0x3]]  ;;  %v358_v0 = vld [vmem:[#allocation7] sm:$0xff]  ;;  %v360_v1 = vld [vmem:[#allocation7 + $0x8] sm:$0xff]  ;;  %s328_s25 = smov [#allocation9]  }
  0x12   :  { %s199_s27 = sld [smem:[#allocation3 + $0x7]]  ;;  %v364_v3 = vld [vmem:[#allocation7 + $0x10] sm:$0xff]  ;;  %v366_v4 = vld [vmem:[#allocation7 + $0x18] sm:$0xff]  ;;  %v370_v9 = vld [vmem:[#allocation7 + $0x20] sm:$0xff]  ;;  %s185_s26 = sshll.u32 %s328_s25, 4  ;;  %s186_s26 = int_to_ptr.vmem [resolvable:$true] %s185_s26 }
  0x13   :  { %s200_s28 = sld [smem:[#allocation3 + $0xb]]  ;;  %v373_v12 = vld [vmem:[#allocation7 + $0x28] sm:$0xff]  ;;  %v380_v21 = vld [vmem:[#allocation7 + $0x30] sm:$0xff]  ;;  %v51_v46 = vld [vmem:[#allocation4] sm:$0xff] }
  0x14   :  { %s201_s29 = sld [smem:[#allocation3 + $0xf]] }
  0x15   :  { %s202_s30 = sld [smem:[#allocation3 + $0x13]] }
  0x16   :  { %s203_s4 = sld [smem:[#allocation3 + $0x17]] }
  0x17   :  { %v66_v2 = vstv %s198_s1  ;;  %s362_s2 = sld [smem:[#allocation3 + $0x1b]] }
  0x18   :  { %v67_v5 = vmul.f32 %v66_v2, %v358_v0  ;;  %v69_v6 = vstv %s199_s27  ;;  %s205_s5 = sld [smem:[#allocation3 + $0x2]] }
  0x19   :  { %v70_v7 = vmul.f32 %v69_v6, %v360_v1  ;;  %v73_v8 = vstv %s200_s28  ;;  %s206_s6 = sld [smem:[#allocation3 + $0x6]]  ;;  %s187_s28 = sshll.u32 %s421_s3, 4  ;;  %s188_s28 = int_to_ptr.hbm [resolvable:$true] %s187_s28 }
  0x1a   :  { %v74_v10 = vmul.f32 %v73_v8, %v364_v3  ;;  %v77_v11 = vstv %s201_s29  ;;  %s207_s7 = sld [smem:[#allocation3 + $0xa]] }
  0x1b   :  { %v71_v13 = vadd.f32 %v70_v7, %v67_v5  ;;  %v78_v14 = vmul.f32 %v77_v11, %v366_v4  ;;  %v81_v15 = vstv %s202_s30  ;;  %s208_s8 = sld [smem:[#allocation3 + $0xe]] }
  0x1c   :  { %v85_v16 = vstv %s203_s4  ;;  %s209_s9 = sld [smem:[#allocation3 + $0x12]]  ;;  %v82_v18 = vmul.f32 %v81_v15, %v370_v9 }
  0x1d   :  { %v75_v17 = vadd.f32 %v74_v10, %v71_v13  ;;  %s210_s10 = sld [smem:[#allocation3 + $0x16]]  ;;  %v86_v19 = vmul.f32 %v85_v16, %v373_v12  ;;  %v89_v23 = vstv %s362_s2 }
  0x1e   :  { %v94_v20 = vstv %s205_s5  ;;  %s378_s11 = sld [smem:[#allocation3 + $0x1a]]  ;;  %v90_v31 = vmul.f32 %v89_v23, %v380_v21 }
  0x1f   :  { %v79_v22 = vadd.f32 %v78_v14, %v75_v17  ;;  %v95_v24 = vmul.f32 %v94_v20, %v358_v0  ;;  %v97_v25 = vstv %s206_s6  ;;  %s212_s12 = sld [smem:[#allocation3 + $0x1]] }
  0x20   :  { %v98_v26 = vmul.f32 %v97_v25, %v360_v1  ;;  %v101_v27 = vstv %s207_s7  ;;  %s213_s13 = sld [smem:[#allocation3 + $0x5]] }
  0x21   :  { %v83_v28 = vadd.f32 %v82_v18, %v79_v22  ;;  %v102_v29 = vmul.f32 %v101_v27, %v364_v3  ;;  %v105_v30 = vstv %s208_s8  ;;  %s214_s14 = sld [smem:[#allocation3 + $0x9]] }
  0x22   :  { %v99_v32 = vadd.f32 %v98_v26, %v95_v24  ;;  %v106_v33 = vmul.f32 %v105_v30, %v366_v4  ;;  %v109_v34 = vstv %s209_s9  ;;  %s215_s15 = sld [smem:[#allocation3 + $0xd]] }
  0x23   :  { %v87_v35 = vadd.f32 %v86_v19, %v83_v28  ;;  %v113_v36 = vstv %s210_s10  ;;  %s388_s16 = sld [smem:[#allocation3 + $0x11]]  ;;  %v110_v38 = vmul.f32 %v109_v34, %v370_v9 }
  0x24   :  { %v103_v37 = vadd.f32 %v102_v29, %v99_v32  ;;  %s391_s17 = sld [smem:[#allocation3 + $0x15]]  ;;  %v114_v39 = vmul.f32 %v113_v36, %v373_v12  ;;  %v117_v40 = vstv %s378_s11 }
  0x25   :  { %v123_v41 = vstv %s212_s12  ;;  %s395_s18 = sld [smem:[#allocation3 + $0x19]]  ;;  %v91_v42 = vadd.f32 %v90_v31, %v87_v35  ;;  %v118_v50 = vmul.f32 %v117_v40, %v380_v21 }
  0x26   :  { %v107_v43 = vadd.f32 %v106_v33, %v103_v37  ;;  %v124_v44 = vmul.f32 %v123_v41, %v358_v0  ;;  %v126_v45 = vstv %s213_s13  ;;  %s151_s19 = sld [smem:[#allocation3]] }
  0x27   :  { %v127_v47 = vmul.f32 %v126_v45, %v360_v1  ;;  %v130_v48 = vstv %s214_s14  ;;  %s219_s20 = sld [smem:[#allocation3 + $0x4]]  ;;  %v92_v56 = vmul.f32 %v91_v42, %v51_v46 }
  0x28   :  { %v111_v49 = vadd.f32 %v110_v38, %v107_v43  ;;  %v131_v51 = vmul.f32 %v130_v48, %v364_v3  ;;  %v134_v52 = vstv %s215_s15  ;;  %s220_s21 = sld [smem:[#allocation3 + $0x8]] }
  0x29   :  { %v128_v53 = vadd.f32 %v127_v47, %v124_v44  ;;  %v135_v54 = vmul.f32 %v134_v52, %v366_v4  ;;  %v138_v55 = vstv %s388_s16  ;;  %s221_s22 = sld [smem:[#allocation3 + $0xc]] }
  0x2a   :  { %v115_v57 = vadd.f32 %v114_v39, %v111_v49  ;;  %v142_v58 = vstv %s391_s17  ;;  %s222_s0 = sld [smem:[#allocation3 + $0x10]]  ;;  %v139_v60 = vmul.f32 %v138_v55, %v370_v9 }
  0x2b   :  { %v132_v59 = vadd.f32 %v131_v51, %v128_v53  ;;  %s223_s23 = sld [smem:[#allocation3 + $0x14]]  ;;  %v146_v62 = vstv %s395_s18  ;;  %v143_v5 = vmul.f32 %v142_v58, %v373_v12 }
  0x2c   :  { %v119_v61 = vadd.f32 %v118_v50, %v115_v57  ;;  %v152_v63 = vstv %s151_s19  ;;  %s224_s24 = sld [smem:[#allocation3 + $0x18]]  ;;  %v147_v14 = vmul.f32 %v146_v62, %v380_v21 }
  0x2d   :  { %v136_v2 = vadd.f32 %v135_v54, %v132_v59  ;;  %v153_v6 = vmul.f32 %v152_v63, %v358_v0  ;;  %v155_v7 = vstv %s219_s20 }
  0x2e   :  { %v120_v8 = vadd.f32 %v119_v61, %v92_v56  ;;  %v156_v10 = vmul.f32 %v155_v7, %v360_v1  ;;  %v159_v11 = vstv %s220_s21 }
  0x2f   :  { %v140_v13 = vadd.f32 %v139_v60, %v136_v2  ;;  %v160_v15 = vmul.f32 %v159_v11, %v364_v3  ;;  %v163_v16 = vstv %s221_s22 }
  0x30   :  { %v157_v17 = vadd.f32 %v156_v10, %v153_v6  ;;  %v164_v18 = vmul.f32 %v163_v16, %v366_v4  ;;  %v167_v19 = vstv %s222_s0  ;;  %v121_v20 = vmul.f32 %v120_v8, %v51_v46 }
  0x31   :  { %v144_v22 = vadd.f32 %v143_v5, %v140_v13  ;;  %v171_v23 = vstv %s223_s23  ;;  %v168_v0 = vmul.f32 %v167_v19, %v370_v9 }
  0x32   :  { %v161_v24 = vadd.f32 %v160_v15, %v157_v17  ;;  %v175_v26 = vstv %s224_s24  ;;  %v172_v27 = vmul.f32 %v171_v23, %v373_v12 }
  0x33   :  { %v148_v25 = vadd.f32 %v147_v14, %v144_v22  ;;  %v176_v3 = vmul.f32 %v175_v26, %v380_v21 }
  0x34   :  { %v165_v1 = vadd.f32 %v164_v18, %v161_v24 }
  0x35   :  { %v149_v28 = vadd.f32 %v148_v25, %v121_v20 }
  0x36   :  { %v169_v29 = vadd.f32 %v168_v0, %v165_v1 }
  0x37   :  { %v150_v30 = vmul.f32 %v149_v28, %v51_v46 }
  0x38   :  { %v173_v31 = vadd.f32 %v172_v27, %v169_v29 }
  0x3a   :  { %v177_v4 = vadd.f32 %v176_v3, %v173_v31 }
  0x3c   :  { %v178_v32 = vadd.f32 %v177_v4, %v150_v30 }
  0x3e   :  { %179 = vst [vmem:[#allocation9] sm:$0xff] %v178_v32 }
  0x3f   :  { %190 = dma.vmem_to_hbm [thread:$0]  %s186_s26, 128, %s188_s28, [#allocation6]  }
  0x40   :  { %321 = dma.done.wait [#allocation6], 128  }
  0x41   :  { %322 = vsyncadd [#allocation6], 4294967168 }
  0x42   :  { %195 = vsyncpa [#allocation5], 1 }
  0x43   :  { %196 = vsyncpa [#allocation8], 1 }
  0x44   :  { %197 = vsyncpa [#allocation6], 1 }

</bundles_post_ra>
